<compile_context>
chip_gen: v7x
topology: tpu7x:2x2x1
jax: 0.10.0
libtpu: 0.0.40
codegen_flags: <defaults>
</compile_context>

<pallas_src>
import functools

import jax
import jax.numpy as jnp
from jax.experimental import pallas as pl
from jax.experimental.pallas import tpu as pltpu


_VMEM_LIMIT_BYTES = 48 * 1024 * 1024    # > default scoped limits, < v7x 64 MiB physical
_FUSED_VMEM_BUDGET = 40 * 1024 * 1024   # per-step budget used to pick fused vs tiled path


# ---------------------------------------------------------------------------
# Fused kernel: one whole (C, HW_pad) slab per batch element per grid step.
# Local GEMMs, global-average-pool + global MLP, and the fuse in ONE HBM pass.
# ---------------------------------------------------------------------------
def _askc_fused_kernel(x_ref, r_ref,
                       wl1_ref, bl1_ref, wl2_ref, bl2_ref,
                       wg1_ref, bg1_ref, wg2_ref, bg2_ref,
                       o_ref, *, inv_hw):
    # x_ref / r_ref / o_ref : (1, C, T)  channels on sublanes, pixels on lanes
    x = x_ref[0]                                              # (C, T)
    res = r_ref[0]                                            # (C, T)
    xa = x + res                                              # activation dtype

    # local attention branch: two 1x1 convs == channel GEMMs, f32 accumulation
    h = jnp.dot(wl1_ref[...], xa, preferred_element_type=jnp.float32)
    h = jnp.maximum(h + bl1_ref[...], 0.0)                    # (Ci, T) f32
    xl = jnp.dot(wl2_ref[...], h.astype(wl2_ref.dtype),
                 preferred_element_type=jnp.float32) + bl2_ref[...]   # (C, T) f32

    # global attention branch: GAP over the lane axis (padded columns are zero,
    # so sum * 1/HW_real is exact) followed by the tiny MLP.
    pooled = jnp.sum(xa.astype(jnp.float32), axis=1, keepdims=True) * inv_hw   # (C, 1)
    hg = jnp.dot(wg1_ref[...], pooled.astype(wg1_ref.dtype),
                 preferred_element_type=jnp.float32)
    hg = jnp.maximum(hg + bg1_ref[...], 0.0)                  # (Ci, 1)
    xg = jnp.dot(wg2_ref[...], hg.astype(wg2_ref.dtype),
                 preferred_element_type=jnp.float32) + bg2_ref[...]   # (C, 1)

    # fuse: 2*x*wei + 2*res*(1-wei) == 2*(res + wei*(x-res)).
    # Sigmoid argument stays f32; the epilogue runs in the activation dtype
    # (halves VALU ops when activations are bf16 on v6e/v7x).
    wei = jax.nn.sigmoid(xl + xg).astype(x.dtype)             # (C, T)
    o_ref[0] = (2.0 * (res + wei * (x - res))).astype(o_ref.dtype)


# ---------------------------------------------------------------------------
# Fallback kernel for very large HW: global branch hoisted to JAX (tiny work),
# the HW axis is tiled, xg broadcasts over the pixel tile.
# ---------------------------------------------------------------------------
def _askc_tiled_kernel(x_ref, r_ref, xg_ref,
                       wl1_ref, bl1_ref, wl2_ref, bl2_ref,
                       o_ref):
    x = x_ref[0]                                              # (C, tile)
    res = r_ref[0]
    xa = x + res
    h = jnp.dot(wl1_ref[...], xa, preferred_element_type=jnp.float32)
    h = jnp.maximum(h + bl1_ref[...], 0.0)
    xl = jnp.dot(wl2_ref[...], h.astype(wl2_ref.dtype),
                 preferred_element_type=jnp.float32) + bl2_ref[...]
    wei = jax.nn.sigmoid(xl + xg_ref[0]).astype(x.dtype)
    o_ref[0] = (2.0 * (res + wei * (x - res))).astype(o_ref.dtype)


def _round_up(n, m):
    return ((n + m - 1) // m) * m


def _pick_hw_tile(hw_pad, max_tile=2048):
    """Largest 128-multiple divisor of hw_pad that is <= max_tile."""
    best = 128
    t = 128
    while t <= min(hw_pad, max_tile):
        if hw_pad % t == 0:
            best = t
        t += 128
    return best


def _fused_fits(C, Ci, hw_pad, act_bytes):
    """Conservative VMEM estimate for the fused per-batch path (v7x-safe)."""
    io = 3 * 2 * C * hw_pad * act_bytes          # x, res, out double-buffered
    tmp = (4 * C + Ci) * hw_pad * 4              # f32 intermediates (xa/xl/wei/h/...)
    return io + tmp <= _FUSED_VMEM_BUDGET


def askc_fuse_pallas(x_nchw, res_nchw, params, *, force_hoisted=False):
    """x_nchw, res_nchw: (N, C, H, W).  Returns (N, C, H, W)."""
    N, C, H, W = x_nchw.shape
    assert res_nchw.shape == x_nchw.shape
    HW = H * W
    HW_pad = _round_up(HW, 128)                  # lane-dense loads/stores always
    Ci = params["wl1"].shape[1]
    act_dtype = x_nchw.dtype
    act_bytes = x_nchw.dtype.itemsize

    # NCHW -> (N, C, HW): pure reshape, no HBM transpose traffic.
    x3 = x_nchw.reshape(N, C, HW)
    r3 = res_nchw.reshape(N, C, HW)
    if HW_pad != HW:
        pad = ((0, 0), (0, 0), (0, HW_pad - HW))
        x3p, r3p = jnp.pad(x3, pad), jnp.pad(r3, pad)
    else:
        x3p, r3p = x3, r3

    # GEMM operand dtype: bf16 wire -> bf16 MXU operands; otherwise f32.
    w_dtype = jnp.bfloat16 if act_dtype == jnp.dtype(jnp.bfloat16) else jnp.float32
    wl1 = params["wl1"].T.astype(w_dtype)        # (Ci, C)
    wl2 = params["wl2"].T.astype(w_dtype)        # (C, Ci)
    bl1 = params["bl1"].T.astype(jnp.float32)    # (Ci, 1)
    bl2 = params["bl2"].T.astype(jnp.float32)    # (C, 1)

    # Advisory cost estimate: the kernel is HBM-bandwidth bound (~5 flops/byte).
    cost = pl.CostEstimate(
        flops=4 * N * HW_pad * C * Ci + 6 * N * C * HW_pad,
        transcendentals=N * C * HW_pad,
        bytes_accessed=3 * N * C * HW_pad * act_bytes)

    use_fused = (not force_hoisted) and _fused_fits(C, Ci, HW_pad, act_bytes)

    if use_fused:
        # ---- fused single-pass path: GAP + global MLP computed in-kernel ----
        wg1 = params["wg1"].T.astype(w_dtype)    # (Ci, C)
        wg2 = params["wg2"].T.astype(w_dtype)    # (C, Ci)
        bg1 = params["bg1"].T.astype(jnp.float32)
        bg2 = params["bg2"].T.astype(jnp.float32)

        img_spec = pl.BlockSpec((1, C, HW_pad), lambda b: (b, 0, 0))

        def const_spec(shape):
            return pl.BlockSpec(shape, lambda b: tuple(0 for _ in shape))

        kernel = functools.partial(_askc_fused_kernel, inv_hw=1.0 / HW)
        out = pl.pallas_call(
            kernel,
            out_shape=jax.ShapeDtypeStruct((N, C, HW_pad), act_dtype),
            grid_spec=pltpu.PrefetchScalarGridSpec(
                num_scalar_prefetch=0,
                grid=(N,),   # N>=2 keeps both v7x TensorCores busy
                in_specs=[
                    img_spec, img_spec,                          # x, residual
                    const_spec((Ci, C)), const_spec((Ci, 1)),    # local conv1
                    const_spec((C, Ci)), const_spec((C, 1)),     # local conv2
                    const_spec((Ci, C)), const_spec((Ci, 1)),    # global conv1
                    const_spec((C, Ci)), const_spec((C, 1)),     # global conv2
                ],
                out_specs=img_spec,
            ),
            compiler_params=pltpu.CompilerParams(
                dimension_semantics=("parallel",),
                vmem_limit_bytes=_VMEM_LIMIT_BYTES),
            cost_estimate=cost,
        )(x3p, r3p, wl1, bl1, wl2, bl2, wg1, bg1, wg2, bg2)
    else:
        # ---- fallback: HW too large to hold resident -> hoist global branch ----
        pooled = jnp.mean((x3 + r3).astype(jnp.float32), axis=2)          # (N, C)
        hg = jax.nn.relu(pooled @ params["wg1"] + params["bg1"])          # (N, Ci)
        xg = (hg @ params["wg2"] + params["bg2"])[:, :, None]             # (N, C, 1)
        xg = xg.astype(jnp.float32)

        tile = _pick_hw_tile(HW_pad)
        img_spec = pl.BlockSpec((1, C, tile), lambda b, t: (b, 0, t))

        def const_spec(shape):
            return pl.BlockSpec(shape, lambda b, t: tuple(0 for _ in shape))

        out = pl.pallas_call(
            _askc_tiled_kernel,
            out_shape=jax.ShapeDtypeStruct((N, C, HW_pad), act_dtype),
            grid_spec=pltpu.PrefetchScalarGridSpec(
                num_scalar_prefetch=0,
                grid=(N, HW_pad // tile),
                in_specs=[
                    img_spec, img_spec,                                   # x, residual
                    pl.BlockSpec((1, C, 1), lambda b, t: (b, 0, 0)),      # xg per batch
                    const_spec((Ci, C)), const_spec((Ci, 1)),             # local conv1
                    const_spec((C, Ci)), const_spec((C, 1)),              # local conv2
                ],
                out_specs=img_spec,
            ),
            compiler_params=pltpu.CompilerParams(
                dimension_semantics=("parallel", "parallel"),
                vmem_limit_bytes=_VMEM_LIMIT_BYTES),
            cost_estimate=cost,
        )(x3p, r3p, xg, wl1, bl1, wl2, bl2)

    if HW_pad != HW:
        out = out[:, :, :HW]
    return out.reshape(N, C, H, W)


# ---------------------------------------------------------------------------
# Parameter construction: deterministic Conv2d(1x1)+BatchNorm2d pairs with
# eval-mode BN folded into the conv weight/bias (pure JAX glue).
# ---------------------------------------------------------------------------
def _fold_conv_bn(key, c_in, c_out, eps=1e-5):
    k1, k2, k3, k4, k5, k6 = jax.random.split(key, 6)
    w = jax.random.normal(k1, (c_in, c_out), jnp.float32) * 0.1
    b = jax.random.normal(k2, (1, c_out), jnp.float32) * 0.1
    gamma = 1.0 + 0.1 * jax.random.normal(k3, (c_out,), jnp.float32)
    beta = 0.1 * jax.random.normal(k4, (c_out,), jnp.float32)
    mean = 0.1 * jax.random.normal(k5, (c_out,), jnp.float32)
    var = jnp.abs(jax.random.normal(k6, (c_out,), jnp.float32)) + 0.5
    scale = gamma / jnp.sqrt(var + eps)
    w_eff = w * scale[None, :]
    b_eff = (b - mean[None, :]) * scale[None, :] + beta[None, :]
    return w_eff, b_eff


def make_params(channels=64, r=4, seed=0):
    inter = channels // r
    key = jax.random.PRNGKey(seed)
    kl1, kl2, kg1, kg2 = jax.random.split(key, 4)
    wl1, bl1 = _fold_conv_bn(kl1, channels, inter)
    wl2, bl2 = _fold_conv_bn(kl2, inter, channels)
    wg1, bg1 = _fold_conv_bn(kg1, channels, inter)
    wg2, bg2 = _fold_conv_bn(kg2, inter, channels)
    return dict(wl1=wl1, bl1=bl1, wl2=wl2, bl2=bl2,
                wg1=wg1, bg1=bg1, wg2=wg2, bg2=bg2)


def askc_fuse_ref(x, res, p):
    """Pure-JAX reference (NCHW, f32)."""
    xa = x + res
    xa_nhwc = jnp.transpose(xa, (0, 2, 3, 1))                      # (N,H,W,C)
    hl = jax.nn.relu(jnp.einsum('nhwc,cd->nhwd', xa_nhwc, p["wl1"]) + p["bl1"][0])
    xl = jnp.einsum('nhwd,dc->nhwc', hl, p["wl2"]) + p["bl2"][0]
    pooled = jnp.mean(xa_nhwc, axis=(1, 2), keepdims=True)         # (N,1,1,C)
    hg = jax.nn.relu(jnp.einsum('nhwc,cd->nhwd', pooled, p["wg1"]) + p["bg1"][0])
    xg = jnp.einsum('nhwd,dc->nhwc', hg, p["wg2"]) + p["bg2"][0]
    wei = jax.nn.sigmoid(xl + xg)
    wei = jnp.transpose(wei, (0, 3, 1, 2))                         # back to NCHW
    return 2.0 * x * wei + 2.0 * res * (1.0 - wei)


if __name__ == "__main__":
    channels, r = 64, 4
    params = make_params(channels=channels, r=r, seed=0)

    key = jax.random.PRNGKey(0)
    # 8x8 exercises the HW->128 padding path; 32x32 is already lane-aligned.
    for (N, H, W) in [(2, 8, 8), (2, 32, 32)]:
        key, kx, kr = jax.random.split(key, 3)
        x = jax.random.normal(kx, (N, channels, H, W), jnp.float32)
        residual = jax.random.normal(kr, (N, channels, H, W), jnp.float32)
        ref = askc_fuse_ref(x, residual, params)

        # fused single-pass path (default)
        out = jax.block_until_ready(askc_fuse_pallas(x, residual, params))
        assert out.shape == (N, channels, H, W)
        err = jnp.max(jnp.abs(out - ref))
        assert err < 1e-4, f"fused path mismatch vs reference: {err}"

        # tiled fallback path (used automatically only when HW exceeds VMEM budget)
        out2 = jax.block_until_ready(
            askc_fuse_pallas(x, residual, params, force_hoisted=True))
        err2 = jnp.max(jnp.abs(out2 - ref))
        assert err2 < 1e-4, f"hoisted path mismatch vs reference: {err2}"

    # bf16-on-the-wire path (bf16 HBM traffic + bf16 MXU operands, f32 accumulate)
    key, kx, kr = jax.random.split(key, 3)
    xb = jax.random.normal(kx, (2, channels, 32, 32), jnp.float32)
    rb = jax.random.normal(kr, (2, channels, 32, 32), jnp.float32)
    xb16, rb16 = xb.astype(jnp.bfloat16), rb.astype(jnp.bfloat16)
    ref_b = askc_fuse_ref(xb16.astype(jnp.float32), rb16.astype(jnp.float32), params)
    out_b = jax.block_until_ready(askc_fuse_pallas(xb16, rb16, params))
    err_b = jnp.max(jnp.abs(out_b.astype(jnp.float32) - ref_b))
    assert err_b < 0.3, f"bf16 path mismatch vs reference: {err_b}"

    print("KERNEL_OK")
</pallas_src>

<mosaic_0001>
module attributes {stable_mosaic.version = 11 : i64} {
  func.func @_askc_fused_kernel(%arg0: i32, %arg1: memref<1x64x128xf32, #tpu.memory_space<vmem>>, %arg2: memref<1x64x128xf32, #tpu.memory_space<vmem>>, %arg3: memref<16x64xf32, #tpu.memory_space<vmem>>, %arg4: memref<16x1xf32, #tpu.memory_space<vmem>>, %arg5: memref<64x16xf32, #tpu.memory_space<vmem>>, %arg6: memref<64x1xf32, #tpu.memory_space<vmem>>, %arg7: memref<16x64xf32, #tpu.memory_space<vmem>>, %arg8: memref<16x1xf32, #tpu.memory_space<vmem>>, %arg9: memref<64x16xf32, #tpu.memory_space<vmem>>, %arg10: memref<64x1xf32, #tpu.memory_space<vmem>>, %arg11: memref<1x64x128xf32, #tpu.memory_space<vmem>>) attributes {dimension_semantics = [#tpu.dimension_semantics<parallel>], iteration_bounds = array<i64: 2>, scalar_prefetch = 0 : i64, scratch_operands = 0 : i64, tpu.core_type = #tpu.core_type<tc>, window_params = [{transform_indices = @transform_0, window_bounds = array<i64: 1, 64, 128>}, {transform_indices = @transform_1, window_bounds = array<i64: 1, 64, 128>}, {pipeline_mode = #tpu.pipeline_mode<synchronous>, transform_indices = @transform_2, window_bounds = array<i64: 16, 64>}, {pipeline_mode = #tpu.pipeline_mode<synchronous>, transform_indices = @transform_3, window_bounds = array<i64: 16, 1>}, {pipeline_mode = #tpu.pipeline_mode<synchronous>, transform_indices = @transform_4, window_bounds = array<i64: 64, 16>}, {pipeline_mode = #tpu.pipeline_mode<synchronous>, transform_indices = @transform_5, window_bounds = array<i64: 64, 1>}, {pipeline_mode = #tpu.pipeline_mode<synchronous>, transform_indices = @transform_6, window_bounds = array<i64: 16, 64>}, {pipeline_mode = #tpu.pipeline_mode<synchronous>, transform_indices = @transform_7, window_bounds = array<i64: 16, 1>}, {pipeline_mode = #tpu.pipeline_mode<synchronous>, transform_indices = @transform_8, window_bounds = array<i64: 64, 16>}, {pipeline_mode = #tpu.pipeline_mode<synchronous>, transform_indices = @transform_9, window_bounds = array<i64: 64, 1>}, {transform_indices = @transform_10, window_bounds = array<i64: 1, 64, 128>}]} {
    %c0 = arith.constant 0 : index
    %c0_0 = arith.constant 0 : index
    %c0_1 = arith.constant 0 : index
    %0 = vector.load %arg1[%c0, %c0_0, %c0_1] : memref<1x64x128xf32, #tpu.memory_space<vmem>>, vector<1x64x128xf32>
    %1 = vector.shape_cast %0 : vector<1x64x128xf32> to vector<64x128xf32>
    %c0_2 = arith.constant 0 : index
    %c0_3 = arith.constant 0 : index
    %c0_4 = arith.constant 0 : index
    %2 = vector.load %arg2[%c0_2, %c0_3, %c0_4] : memref<1x64x128xf32, #tpu.memory_space<vmem>>, vector<1x64x128xf32>
    %3 = vector.shape_cast %2 : vector<1x64x128xf32> to vector<64x128xf32>
    %4 = arith.addf %1, %3 : vector<64x128xf32>
    %c0_5 = arith.constant 0 : index
    %c0_6 = arith.constant 0 : index
    %5 = vector.load %arg3[%c0_5, %c0_6] : memref<16x64xf32, #tpu.memory_space<vmem>>, vector<16x64xf32>
    %cst = arith.constant dense<0.000000e+00> : vector<16x128xf32>
    %6 = tpu.matmul %5, %4, %cst {dimension_numbers = #tpu.dot_dimension_numbers<[1], [0], [0], [1], [0, 0, 1, 1], [], []>} : vector<16x64xf32>, vector<64x128xf32>, vector<16x128xf32> -> vector<16x128xf32>
    %c0_7 = arith.constant 0 : index
    %c0_8 = arith.constant 0 : index
    %7 = vector.load %arg4[%c0_7, %c0_8] : memref<16x1xf32, #tpu.memory_space<vmem>>, vector<16x1xf32>
    %8 = vector.broadcast %7 : vector<16x1xf32> to vector<16x128xf32>
    %9 = arith.addf %6, %8 : vector<16x128xf32>
    %cst_9 = arith.constant 0.000000e+00 : f32
    %10 = vector.broadcast %cst_9 : f32 to vector<16x128xf32>
    %11 = arith.maximumf %9, %10 : vector<16x128xf32>
    %c0_10 = arith.constant 0 : index
    %c0_11 = arith.constant 0 : index
    %12 = vector.load %arg5[%c0_10, %c0_11] : memref<64x16xf32, #tpu.memory_space<vmem>>, vector<64x16xf32>
    %cst_12 = arith.constant dense<0.000000e+00> : vector<64x128xf32>
    %13 = tpu.matmul %12, %11, %cst_12 {dimension_numbers = #tpu.dot_dimension_numbers<[1], [0], [0], [1], [0, 0, 1, 1], [], []>} : vector<64x16xf32>, vector<16x128xf32>, vector<64x128xf32> -> vector<64x128xf32>
    %c0_13 = arith.constant 0 : index
    %c0_14 = arith.constant 0 : index
    %14 = vector.load %arg6[%c0_13, %c0_14] : memref<64x1xf32, #tpu.memory_space<vmem>>, vector<64x1xf32>
    %15 = vector.broadcast %14 : vector<64x1xf32> to vector<64x128xf32>
    %16 = arith.addf %13, %15 : vector<64x128xf32>
    %cst_15 = arith.constant dense<0.000000e+00> : vector<64xf32>
    %17 = vector.multi_reduction <add>, %4, %cst_15 [1] : vector<64x128xf32> to vector<64xf32>
    %18 = vector.shape_cast %17 : vector<64xf32> to vector<64x1xf32>
    %cst_16 = arith.constant 1.562500e-02 : f32
    %19 = vector.broadcast %cst_16 : f32 to vector<64x1xf32>
    %20 = arith.mulf %18, %19 : vector<64x1xf32>
    %c0_17 = arith.constant 0 : index
    %c0_18 = arith.constant 0 : index
    %21 = vector.load %arg7[%c0_17, %c0_18] : memref<16x64xf32, #tpu.memory_space<vmem>>, vector<16x64xf32>
    %cst_19 = arith.constant dense<0.000000e+00> : vector<16x1xf32>
    %22 = tpu.matmul %21, %20, %cst_19 {dimension_numbers = #tpu.dot_dimension_numbers<[1], [0], [0], [1], [0, 0, 1, 1], [], []>} : vector<16x64xf32>, vector<64x1xf32>, vector<16x1xf32> -> vector<16x1xf32>
    %c0_20 = arith.constant 0 : index
    %c0_21 = arith.constant 0 : index
    %23 = vector.load %arg8[%c0_20, %c0_21] : memref<16x1xf32, #tpu.memory_space<vmem>>, vector<16x1xf32>
    %24 = arith.addf %22, %23 : vector<16x1xf32>
    %cst_22 = arith.constant 0.000000e+00 : f32
    %25 = vector.broadcast %cst_22 : f32 to vector<16x1xf32>
    %26 = arith.maximumf %24, %25 : vector<16x1xf32>
    %c0_23 = arith.constant 0 : index
    %c0_24 = arith.constant 0 : index
    %27 = vector.load %arg9[%c0_23, %c0_24] : memref<64x16xf32, #tpu.memory_space<vmem>>, vector<64x16xf32>
    %cst_25 = arith.constant dense<0.000000e+00> : vector<64x1xf32>
    %28 = tpu.matmul %27, %26, %cst_25 {dimension_numbers = #tpu.dot_dimension_numbers<[1], [0], [0], [1], [0, 0, 1, 1], [], []>} : vector<64x16xf32>, vector<16x1xf32>, vector<64x1xf32> -> vector<64x1xf32>
    %c0_26 = arith.constant 0 : index
    %c0_27 = arith.constant 0 : index
    %29 = vector.load %arg10[%c0_26, %c0_27] : memref<64x1xf32, #tpu.memory_space<vmem>>, vector<64x1xf32>
    %30 = arith.addf %28, %29 : vector<64x1xf32>
    %31 = vector.broadcast %30 : vector<64x1xf32> to vector<64x128xf32>
    %32 = arith.addf %16, %31 : vector<64x128xf32>
    %33 = arith.negf %32 : vector<64x128xf32>
    %34 = math.exp %33 : vector<64x128xf32>
    %cst_28 = arith.constant 1.000000e+00 : f32
    %35 = vector.broadcast %cst_28 : f32 to vector<64x128xf32>
    %36 = arith.addf %35, %34 : vector<64x128xf32>
    %37 = arith.divf %35, %36 : vector<64x128xf32>
    %38 = arith.subf %1, %3 : vector<64x128xf32>
    %39 = arith.mulf %37, %38 : vector<64x128xf32>
    %40 = arith.addf %3, %39 : vector<64x128xf32>
    %cst_29 = arith.constant 2.000000e+00 : f32
    %41 = vector.broadcast %cst_29 : f32 to vector<64x128xf32>
    %42 = arith.mulf %41, %40 : vector<64x128xf32>
    %c0_30 = arith.constant 0 : index
    %c0_31 = arith.constant 0 : index
    %c0_32 = arith.constant 0 : index
    %43 = vector.load %arg11[%c0_30, %c0_31, %c0_32] : memref<1x64x128xf32, #tpu.memory_space<vmem>>, vector<1x64x128xf32>
    %44 = vector.shape_cast %43 : vector<1x64x128xf32> to vector<64x128xf32>
    %45 = vector.shape_cast %42 : vector<64x128xf32> to vector<1x64x128xf32>
    tpu.vector_store %arg11[%c0_30, %c0_31, %c0_32], %45 {strides = array<i32>} : memref<1x64x128xf32, #tpu.memory_space<vmem>>, vector<1x64x128xf32>,
    return
  }
  func.func @transform_0(%arg0: i32) -> (i32, i32, i32) {
    %c0_i32 = arith.constant 0 : i32
    %c0_i32_0 = arith.constant 0 : i32
    %c0_i32_1 = arith.constant 0 : i32
    return %arg0, %c0_i32, %c0_i32_0 : i32, i32, i32
  }
  func.func @transform_1(%arg0: i32) -> (i32, i32, i32) {
    %c0_i32 = arith.constant 0 : i32
    %c0_i32_0 = arith.constant 0 : i32
    %c0_i32_1 = arith.constant 0 : i32
    return %arg0, %c0_i32, %c0_i32_0 : i32, i32, i32
  }
  func.func @transform_2(%arg0: i32) -> (i32, i32) {
    %c0_i32 = arith.constant 0 : i32
    %c0_i32_0 = arith.constant 0 : i32
    %c0_i32_1 = arith.constant 0 : i32
    return %c0_i32, %c0_i32_0 : i32, i32
  }
  func.func @transform_3(%arg0: i32) -> (i32, i32) {
    %c0_i32 = arith.constant 0 : i32
    %c0_i32_0 = arith.constant 0 : i32
    %c0_i32_1 = arith.constant 0 : i32
    return %c0_i32, %c0_i32_0 : i32, i32
  }
  func.func @transform_4(%arg0: i32) -> (i32, i32) {
    %c0_i32 = arith.constant 0 : i32
    %c0_i32_0 = arith.constant 0 : i32
    %c0_i32_1 = arith.constant 0 : i32
    return %c0_i32, %c0_i32_0 : i32, i32
  }
  func.func @transform_5(%arg0: i32) -> (i32, i32) {
    %c0_i32 = arith.constant 0 : i32
    %c0_i32_0 = arith.constant 0 : i32
    %c0_i32_1 = arith.constant 0 : i32
    return %c0_i32, %c0_i32_0 : i32, i32
  }
  func.func @transform_6(%arg0: i32) -> (i32, i32) {
    %c0_i32 = arith.constant 0 : i32
    %c0_i32_0 = arith.constant 0 : i32
    %c0_i32_1 = arith.constant 0 : i32
    return %c0_i32, %c0_i32_0 : i32, i32
  }
  func.func @transform_7(%arg0: i32) -> (i32, i32) {
    %c0_i32 = arith.constant 0 : i32
    %c0_i32_0 = arith.constant 0 : i32
    %c0_i32_1 = arith.constant 0 : i32
    return %c0_i32, %c0_i32_0 : i32, i32
  }
  func.func @transform_8(%arg0: i32) -> (i32, i32) {
    %c0_i32 = arith.constant 0 : i32
    %c0_i32_0 = arith.constant 0 : i32
    %c0_i32_1 = arith.constant 0 : i32
    return %c0_i32, %c0_i32_0 : i32, i32
  }
  func.func @transform_9(%arg0: i32) -> (i32, i32) {
    %c0_i32 = arith.constant 0 : i32
    %c0_i32_0 = arith.constant 0 : i32
    %c0_i32_1 = arith.constant 0 : i32
    return %c0_i32, %c0_i32_0 : i32, i32
  }
  func.func @transform_10(%arg0: i32) -> (i32, i32, i32) {
    %c0_i32 = arith.constant 0 : i32
    %c0_i32_0 = arith.constant 0 : i32
    %c0_i32_1 = arith.constant 0 : i32
    return %arg0, %c0_i32, %c0_i32_0 : i32, i32, i32
  }
}

</mosaic_0001>

<bundles_post_ra>
// kernel: tpu_custom_call.1
= control target key start
LH: loop header
LB: loop body
LE: loop exit
PB: predicated region body
PF: predicated region fallthrough
CT: control target
= control target key end

     0   :  { %15 = vsyncpa [#allocation3], 0  ;;  %s1919_s0 = inlined_call_operand.vmem [shape: f32[2,64,128], index: 0, kind: input, shape index: {}]   ;;  %s1920_s1 = inlined_call_operand.vmem [shape: f32[2,64,128], index: 1, kind: input, shape index: {}]   ;;  %s1921_s2 = inlined_call_operand.vmem [shape: f32[16,64], index: 2, kind: input, shape index: {}]   ;;  %s1922_s3 = inlined_call_operand.vmem [shape: f32[16,1], index: 3, kind: input, shape index: {}]   ;;  %s1923_s4 = inlined_call_operand.vmem [shape: f32[64,16], index: 4, kind: input, shape index: {}]   ;;  %s1924_s5 = inlined_call_operand.vmem [shape: f32[64,1], index: 5, kind: input, shape index: {}]   ;;  %s1925_s6 = inlined_call_operand.vmem [shape: f32[16,64], index: 6, kind: input, shape index: {}]   ;;  %s1926_s7 = inlined_call_operand.vmem [shape: f32[16,1], index: 7, kind: input, shape index: {}]   ;;  %s1927_s8 = inlined_call_operand.vmem [shape: f32[64,16], index: 8, kind: input, shape index: {}]   ;;  %s1928_s9 = inlined_call_operand.vmem [shape: f32[64,1], index: 9, kind: input, shape index: {}]   ;;  %s1929_s10 = inlined_call_operand.hbm [shape: f32[2,64,128], index: 10, kind: output, shape index: {}]  }
   0x1   :  { %17 = vsyncpa [#allocation3 + $0x1], 0  ;;  %s1562_s13 = smov 0   ;;  %s1564_s14 = smov 0  }
   0x2   :  { %s1566_s15 = smov 0   ;;  %s1568_s16 = smov 0  }
   0x3 LB: > { %s1583_s17 = sadd.s32 4294967295, %s1501_s16   ;;  %s1166_s18 = sadd.s32 4294967294, %s1501_s16   ;;  %s1501_s16 = sphi %s1568_s16, %s1935_s16   ;;  %s1497_s15 = sphi %s1566_s15, %s1934_s15   ;;  %s1493_s14 = sphi %s1564_s14, %s1933_s14   ;;  %s1489_s13 = sphi %s1562_s13, %s1932_s13  }
   0x4   : > { %s1587_s19 = sadd.s32 1, %s1501_s16   ;;  %s250_s20 = sadd.s32 1, %s1497_s15 }
   0x5   : > { %s247_s21 = ssub.s32 %s1501_s16, %s1587_s19  ;;  %p260_p0 = scmp.ne.s32.totalorder %s1497_s15, %s1493_s14 }
   0x6   : > { %p248_p1 = scmp.eq.s32.totalorder %s247_s21, 0  ;;  %p261_p2 = scmp.eq.s32.totalorder %s1583_s17, 1 }
   0x7   : > { %p266_p3 = scmp.ne.s32.totalorder %s1493_s14, %s1489_s13  ;;  %p267_p4 = scmp.eq.s32.totalorder %s1166_s18, 1 }
   0x8   : > { %s1598_s22 = scalar_select %p248_p1, %s1497_s15, %s250_s20  }
   0x9   : > { %p1600_p5 = por %p261_p2, %p260_p0  ;;  %p1604_p6 = por %p267_p4, %p266_p3 }
   0xa   : > { %p1169_p7 = scmp.ge.s32.totalorder %s1501_s16, 1  ;;  %p325_p8 = scmp.lt.s32.totalorder %s1501_s16, 3 }
   0xc   : > { %p326_p9 = pnand %p1169_p7, %p325_p8 }
   0xd   : > { %v404_v0 = vld [vmem:[%s1922_s3] sm:$0xff] (!%p326_p9)  ;;  %p368_p10 = scmp.lt.s32.totalorder (!%p326_p9), %s1583_s17, 1  ;;  %vm416_vm0 = vcmask (!%p326_p9), 523264   ;;  %v1503_v2 = vmov (!%p326_p9), 0   ;;  %v405_v3 = vld [vmem:[%s1922_s3 + $0x8] sm:$0xff] (!%p326_p9)  ;;  %v510_v34 = vld [vmem:[%s1924_s5 + $0x10] sm:$0xff] (!%p326_p9) }
   0xe   : > { %329 = sbr.rel (%p326_p9) target bundleno = 915 (0x393), region = 60  ;;  %v402_v1 = vld [vmem:[%s1921_s2] sm:$0xff] (!%p326_p9)  ;;  %1405 = vset.pattern.permute.xlu1 (!%p326_p9), %v1503_v2  ;;  %1406 = vset.pattern.permute.xlu0 (!%p326_p9), %v1503_v2  ;;  %v403_v32 = vld [vmem:[%s1921_s2 + $0x8] sm:$0xff] (!%p326_p9)  ;;  %v511_v35 = vld [vmem:[%s1924_s5 + $0x18] sm:$0xff] (!%p326_p9)  ;;  %vm556_vm1 = vcmask (!%p326_p9), 130048   ;;  %s365_s25 = sand.u32 (!%p326_p9), 1, %s1493_s14  }
   0xf   : > { %1267 = vmatprep.mubr.msk.f32.mxu0 (!%p326_p9), %vm416_vm0, %v402_v1  ;;  %408 = vperm.xlu1 (!%p326_p9), %1405, %v404_v0   ;;  %v509_v33 = vld [vmem:[%s1924_s5 + $0x8] sm:$0xff] (!%p326_p9)  ;;  %v512_v36 = vld [vmem:[%s1924_s5 + $0x20] sm:$0xff] (!%p326_p9)  ;;  %v514_v37 = vld [vmem:[%s1924_s5 + $0x30] sm:$0xff] (!%p326_p9)  ;;  %s1170_s26 = sshll.u32 (!%p326_p9), %s365_s25, 6  ;;  %s1210_s28 = sshll.u32 (!%p326_p9), %s1583_s17, 10 }
  0x10   : > { %v500_v38 = vld [vmem:[%s1923_s4] sm:$0xff] (!%p326_p9)  ;;  %v513_v40 = vld [vmem:[%s1924_s5 + $0x28] sm:$0xff] (!%p326_p9)  ;;  %v515_v41 = vld [vmem:[%s1924_s5 + $0x38] sm:$0xff] (!%p326_p9)  ;;  %s1878_s18 = scalar_lea.sflag (!%p326_p9), [#allocation3], %s365_s25  ;;  %s1504_s20 = smov (!%p326_p9), [#allocation2]  }
  0x11   : > { %1274 = vmatprep.mubr.msk.f32.mxu1 (!%p326_p9), %vm556_vm1, %v500_v38  ;;  %v508_v39 = vld [vmem:[%s1924_s5] sm:$0xff] (!%p326_p9)  ;;  %v501_v63 = vld [vmem:[%s1923_s4 + $0x8] sm:$0xff] (!%p326_p9)  ;;  %v502_v0 = vld [vmem:[%s1923_s4 + $0x10] sm:$0xff] (!%p326_p9) }
  0x13   : > { %413 = vperm.xlu1 (!%p326_p9), %1405, %v405_v3  }
  0x15   : > { %s369_s29 = scalar_select %p368_p10, %s1583_s17, 1 }
  0x17   : > { %s1208_s12 = sshll.u32 %s369_s29, 6 }
  0x18   : > { %s372_s21 = scalar_lea.vmem %s1919_s0, %s1208_s12  ;;  %s377_s27 = scalar_lea.vmem %s1920_s1, %s1208_s12 }
  0x19   : > { %v1628_v4 = vld [vmem:[%s372_s21] sm:$0xff]  ;;  %v1630_v5 = vld [vmem:[%s372_s21 + $0x8] sm:$0xff]  ;;  %v1638_v9 = vld [vmem:[%s372_s21 + $0x10] sm:$0xff]  ;;  %s1871_s12 = scalar_lea.hbm %s1929_s10, %s1210_s28 }
  0x1a   : > { %v1632_v6 = vld [vmem:[%s377_s27] sm:$0xff]  ;;  %v1634_v7 = vld [vmem:[%s377_s27 + $0x8] sm:$0xff]  ;;  %v1640_v10 = vld [vmem:[%s372_s21 + $0x18] sm:$0xff] }
  0x1b   : > { %v394_v8 = vadd.f32 %v1632_v6, %v1628_v4  ;;  %v395_v11 = vadd.f32 %v1634_v7, %v1630_v5  ;;  %v1644_v12 = vld [vmem:[%s377_s27 + $0x10] sm:$0xff]  ;;  %v1646_v13 = vld [vmem:[%s377_s27 + $0x18] sm:$0xff]  ;;  %v1648_v14 = vld [vmem:[%s372_s21 + $0x20] sm:$0xff] }
  0x1c   : > { %v396_v15 = vadd.f32 %v1644_v12, %v1638_v9  ;;  %v397_v16 = vadd.f32 %v1646_v13, %v1640_v10  ;;  %v1654_v17 = vld [vmem:[%s372_s21 + $0x28] sm:$0xff]  ;;  %v1656_v18 = vld [vmem:[%s377_s27 + $0x20] sm:$0xff]  ;;  %v1664_v23 = vld [vmem:[%s372_s21 + $0x30] sm:$0xff] }
  0x1d   : > { %v1658_v19 = vld [vmem:[%s377_s27 + $0x28] sm:$0xff]  ;;  %686 = vadd.xlane.f32.xlu0 %v394_v8  ;;  %v1321_v20 = vpack.c.bf16 %v395_v11, %v394_v8  ;;  %v398_v21 = vadd.f32 %v1656_v18, %v1648_v14  ;;  %v1666_v25 = vld [vmem:[%s372_s21 + $0x38] sm:$0xff]  ;;  %v1668_v26 = vld [vmem:[%s377_s27 + $0x30] sm:$0xff]  ;;  %s1443_s21 = sshll.u32 %s1504_s20, 4  ;;  %s1444_s21 = int_to_ptr.vmem [resolvable:$false] %s1443_s21 }
  0x1e   : > { %v399_v22 = vadd.f32 %v1658_v19, %v1654_v17  ;;  %v1325_v24 = vpack.c.bf16 %v397_v16, %v396_v15  ;;  %v1670_v27 = vld [vmem:[%s377_s27 + $0x38] sm:$0xff]  ;;  %v400_v29 = vadd.f32 %v1668_v26, %v1664_v23  ;;  %s1847_s27 = scalar_lea.vmem [#allocation2], %s1170_s26  ;;  %s1445_s26 = scalar_lea.vmem %s1444_s21, 2048 }
  0x1f   : > { %1322 = vmatprep.subr.bf16.mxu0 %v1321_v20  ;;  %v401_v30 = vadd.f32 %v1670_v27, %v1666_v25  ;;  %s1092_s29 = sshll.u32 %s1847_s27, 4  ;;  %s1873_s29 = int_to_ptr.vmem [resolvable:$true] %s1092_s29 }
  0x20   : > { %1324 = vmatpush3.bf16.msra.mxu0 %v1321_v20  ;;  %v1329_v28 = vpack.c.bf16 %v399_v22, %v398_v21  ;;  %s1439_s17 = scalar_lea.vmem %s1873_s29, 1024  ;;  %p1446_p0 = scmp.lt.s32.totalorder %s1873_s29, %s1444_s21 }
  0x21   : > { %688 = vadd.xlane.f32.xlu0 %v395_v11  ;;  %1326 = vmatprep.subr.bf16.mxu0 %v1325_v24  ;;  %v1333_v31 = vpack.c.bf16 %v401_v30, %v400_v29  ;;  %v503_v11 = vld [vmem:[%s1923_s4 + $0x18] sm:$0xff]  ;;  %p1440_p11 = scmp.ne.s32.totalorder %s1873_s29, %s1439_s17  ;;  %p1447_p1 = scmp.lt.s32.totalorder %s1445_s26, %s1439_s17 }
  0x23   : > { %p1441_p12 = pnand %p1440_p11, %p1600_p5  ;;  %p1448_p2 = por %p1447_p1, %p1446_p0 }
  0x24   : > { %1328 = vmatpush3.bf16.msra.mxu0 %v1325_v24  ;;  %v506_v24 = vld [vmem:[%s1923_s4 + $0x30] sm:$0xff] }
  0x25   : > { %690 = vadd.xlane.f32.xlu0 %v396_v15  ;;  %1330 = vmatprep.subr.bf16.mxu0 %v1329_v28  ;;  %v504_v15 = vld [vmem:[%s1923_s4 + $0x20] sm:$0xff]  ;;  %p1442_p13 = pneg %p1441_p12 }
  0x27   : > { %p1449_p3 = pnand %p1448_p2, %p1442_p13 }
  0x28   : > { %1332 = vmatpush3.bf16.msra.mxu0 %v1329_v28 }
  0x29   : > { %694 = vadd.xlane.f32.xlu0 %v398_v21  ;;  %1334 = vmatprep.subr.bf16.mxu0 %v1333_v31 }
  0x2c   : > { %1336 = vmatpush3.bf16.msra.mxu0 %v1333_v31  ;;  %v711_v31 = vld [vmem:[%s1925_s6 + $0x8] sm:$0xff] }
  0x2d   : > { %696 = vadd.xlane.f32.xlu0 %v399_v22  ;;  %v505_v22 = vld [vmem:[%s1923_s4 + $0x28] sm:$0xff] }
  0x2f   : > { %1268 = vmatmul.mubr.msk.f32.vlgmr.msra.gmra.mrb[0].mxu0 %vm416_vm0, %v403_v32  ;;  %v797_v32 = vld [vmem:[%s1927_s8] sm:$0xff] }
  0x30   : > { %1309 = vmatprep.mubr.msk.f32.mxu0 %vm556_vm1, %v797_v32 }
  0x31   : > { %698 = vadd.xlane.f32.xlu0 %v400_v29  ;;  %v507_v29 = vld [vmem:[%s1923_s4 + $0x38] sm:$0xff] }
  0x35   : > { %700 = vadd.xlane.f32.xlu0 %v401_v30  ;;  %v710_v30 = vld [vmem:[%s1925_s6] sm:$0xff] }
  0x37   : > { %692 = vadd.xlane.f32.xlu1 %v397_v16 }
  0x48   : > { %523 = vperm.xlu1 %1405, %v509_v33   ;;  %v803_v33 = vld [vmem:[%s1927_s8 + $0x30] sm:$0xff] }
  0x4b   : > { %518 = vperm.xlu0 %1406, %v508_v39  }
  0x4c   : > { %528 = vperm.xlu1 %1405, %v510_v34  }
  0x4f   : > { %543 = vperm.xlu0 %1406, %v513_v40  }
  0x50   : > { %533 = vperm.xlu1 %1405, %v511_v35  }
  0x53   : > { %553 = vperm.xlu0 %1406, %v515_v41  }
  0x54   : > { %538 = vperm.xlu1 %1405, %v512_v36  }
  0x58   : > { %548 = vperm.xlu1 %1405, %v514_v37  }
  0x8e   : > { %v409_v45 = vpop.permute.xlu1 %408 }
  0x92   : > { %v414_v47 = vpop.permute.xlu1 %413 }
  0xaa   : > { %v687_v42 = vpop.xlane.xlu0 %686 }
  0xab   : > { %v702_v54 = vmul.f32 0.015625, %v687_v42  ;;  %v713_v42 = vld [vmem:[%s1926_s7 + $0x8] sm:$0xff] }
  0xae   : > { %v689_v43 = vpop.xlane.xlu0 %688 }
  0xaf   : > { %v703_v55 = vmul.f32 0.015625, %v689_v43  ;;  %v712_v43 = vld [vmem:[%s1926_s7] sm:$0xff] }
  0xb1   : > { %v1341_v61 = vpack.c.bf16 %v703_v55, %v702_v54  ;;  %v800_v54 = vld [vmem:[%s1927_s8 + $0x18] sm:$0xff]  ;;  %v801_v55 = vld [vmem:[%s1927_s8 + $0x20] sm:$0xff] }
  0xb2   : > { %v691_v44 = vpop.xlane.xlu0 %690 }
  0xb3   : > { %v704_v62 = vmul.f32 0.015625, %v691_v44 }
  0xb6   : > { %v695_v46 = vpop.xlane.xlu0 %694 }
  0xb7   : > { %v706_v2 = vmul.f32 0.015625, %v695_v46 }
  0xba   : > { %v697_v51 = vpop.xlane.xlu0 %696 }
  0xbb   : > { %v707_v3 = vmul.f32 0.015625, %v697_v51  ;;  %v798_v51 = vld [vmem:[%s1927_s8 + $0x8] sm:$0xff] }
  0xbd   : > { %v1349_v16 = vpack.c.bf16 %v707_v3, %v706_v2  ;;  %v807_v2 = vld [vmem:[%s1928_s9 + $0x10] sm:$0xff] }
  0xbe   : > { %v699_v59 = vpop.xlane.xlu0 %698 }
  0xbf   : > { %v708_v20 = vmul.f32 0.015625, %v699_v59 }
  0xc2   : > { %v701_v8 = vpop.xlane.xlu0 %700 }
  0xc3   : > { %v709_v21 = vmul.f32 0.015625, %v701_v8 }
  0xc4   : > { %v693_v58 = vpop.xlane.xlu1 %692 }
  0xc5   : > { %v705_v60 = vmul.f32 0.015625, %v693_v58  ;;  %v1353_v28 = vpack.c.bf16 %v709_v21, %v708_v20  ;;  %v805_v58 = vld [vmem:[%s1928_s9] sm:$0xff] }
  0xc6   : > { %v809_v20 = vld [vmem:[%s1928_s9 + $0x20] sm:$0xff] }
  0xc7   : > { %v1345_v1 = vpack.c.bf16 %v705_v60, %v704_v62 }
 0x102   : > { %v1269_v48 = vpop.f32.mrb[0].mxu0 }
 0x103   : > { %v495_v49 = vadd.f32 %v1269_v48, %v414_v47  ;;  %v489_v50 = vpop.f32.mrb[1].mxu0 }
 0x104   : > { %v490_v52 = vadd.f32 %v489_v50, %v409_v45 }
 0x105   : > { %v499_v53 = vmax.f32 %v495_v49, 0.0 }
 0x106   : > { %v498_v56 = vmax.f32 %v490_v52, 0.0  ;;  %v804_v52 = vld [vmem:[%s1927_s8 + $0x38] sm:$0xff] }
 0x108   : > { %v1337_v57 = vpack.c.bf16 %v499_v53, %v498_v56  ;;  %v799_v53 = vld [vmem:[%s1927_s8 + $0x10] sm:$0xff]  ;;  %v802_v56 = vld [vmem:[%s1927_s8 + $0x28] sm:$0xff] }
 0x10a   : > { %1338 = vmatprep.subr.bf16.mxu1 %v1337_v57 }
 0x10b   : > { %1340 = vmatpush3.bf16.msra.mxu1 %v1337_v57  ;;  %v806_v57 = vld [vmem:[%s1928_s9 + $0x8] sm:$0xff] }
 0x10c   : > { %1342 = vmatprep.subr.bf16.mxu1 %v1341_v61 }
 0x10e   : > { %1275 = vmatmul.mubr.msk.f32.vlgmr.msra.gmra.mrb[0].mxu1 %vm556_vm1, %v501_v63 }
 0x10f   : > { %1344 = vmatpush3.bf16.msra.mxu1 %v1341_v61  ;;  %1277 = vmatprep.mubr.msk.f32.mxu1 %vm556_vm1, %v502_v0 }
 0x110   : > { %1346 = vmatprep.subr.bf16.mxu1 %v1345_v1 }
 0x112   : > { %1278 = vmatmul.mubr.msk.f32.gmra.mrb[2].mxu1 %vm556_vm1, %v503_v11 }
 0x113   : > { %1348 = vmatpush3.bf16.msra.mxu1 %v1345_v1  ;;  %1280 = vmatprep.mubr.msk.f32.mxu1 %vm556_vm1, %v504_v15  ;;  %v808_v1 = vld [vmem:[%s1928_s9 + $0x18] sm:$0xff] }
 0x114   : > { %1350 = vmatprep.subr.bf16.mxu1 %v1349_v16 }
 0x116   : > { %1281 = vmatmul.mubr.msk.f32.gmra.mrb[4].mxu1 %vm556_vm1, %v505_v22  ;;  %v812_v22 = vld [vmem:[%s1928_s9 + $0x38] sm:$0xff] }
 0x117   : > { %1352 = vmatpush3.bf16.msra.mxu1 %v1349_v16  ;;  %1283 = vmatprep.mubr.msk.f32.mxu1 %vm556_vm1, %v506_v24  ;;  %v810_v16 = vld [vmem:[%s1928_s9 + $0x28] sm:$0xff] }
 0x118   : > { %1354 = vmatprep.subr.bf16.mxu1 %v1353_v28 }
 0x11a   : > { %1284 = vmatmul.mubr.msk.f32.gmra.mrb[6].mxu1 %vm556_vm1, %v507_v29  ;;  %v811_v29 = vld [vmem:[%s1928_s9 + $0x30] sm:$0xff] }
 0x11b   : > { %1356 = vmatpush3.bf16.msra.mxu1 %v1353_v28  ;;  %1302 = vmatprep.mubr.msk.f32.mxu1 %vm416_vm0, %v710_v30 }
 0x11e   : > { %1303 = vmatmul.mubr.msk.f32.vlgmr.msra.gmra.mrb[8].mxu1 %vm416_vm0, %v711_v31 }
 0x11f   : > { %1318 = vmatprep.mubr.msk.f32.mxu1 %vm556_vm1, %v803_v33  ;;  %v524_v33 = vpop.permute.xlu1 %523 }
 0x1e1   : > { %v1752_v34 = vpop.f32.mrb[0].mxu1 }
 0x1e2   : > { %v1754_v35 = vpop.f32.mrb[1].mxu1 }
 0x1e5   : > { %v1756_v36 = vpop.f32.mrb[2].mxu1 }
 0x1e6   : > { %v1758_v37 = vpop.f32.mrb[3].mxu1 }
 0x1e9   : > { %v1760_v38 = vpop.f32.mrb[4].mxu1 }
 0x1ea   : > { %v1762_v39 = vpop.f32.mrb[5].mxu1 }
 0x1ed   : > { %v1764_v40 = vpop.f32.mrb[6].mxu1 }
 0x1ee   : > { %v1766_v41 = vpop.f32.mrb[7].mxu1 }
 0x1f1   : > { %v1304_v44 = vpop.f32.mrb[8].mxu1 }
 0x1f2   : > { %v792_v45 = vadd.f32 %v1304_v44, %v713_v42  ;;  %v786_v46 = vpop.f32.mrb[9].mxu1  ;;  %v529_v42 = vpop.permute.xlu1 %528 }
 0x1f3   : > { %v787_v47 = vadd.f32 %v786_v46, %v712_v43  ;;  %v519_v44 = vpop.permute.xlu0 %518 }
 0x1f4   : > { %v796_v48 = vmax.f32 %v792_v45, 0.0 }
 0x1f5   : > { %v795_v49 = vmax.f32 %v787_v47, 0.0 }
 0x1f6   : > { %v534_v43 = vpop.permute.xlu1 %533 }
 0x1f7   : > { %v1357_v50 = vpack.c.bf16 %v796_v48, %v795_v49  ;;  %v544_v45 = vpop.permute.xlu0 %543  ;;  %v653_v49 = vadd.f32 %v1752_v34, %v524_v33 }
 0x1f8   : > { %v673_v34 = vadd.f32 %v1760_v38, %v544_v45 }
 0x1f9   : > { %1358 = vmatprep.subr.bf16.mxu0 %v1357_v50  ;;  %1361 = vmatprep.subr.bf16.mxu1 %v1357_v50 }
 0x1fa   : > { %1360 = vmatpush3.bf16.msra.mxu0 %v1357_v50  ;;  %1362 = vmatpush3.bf16.msra.mxu1 %v1357_v50  ;;  %v539_v46 = vpop.permute.xlu1 %538  ;;  %v648_v50 = vadd.f32 %v1754_v35, %v519_v44  ;;  %v1039_v44 = vsub.f32 %v1630_v5, %v1634_v7  ;;  %v1040_v5 = vsub.f32 %v1638_v9, %v1644_v12 }
 0x1fb   : > { %v554_v47 = vpop.permute.xlu0 %553  ;;  %v668_v35 = vadd.f32 %v1762_v39, %v539_v46  ;;  %v1038_v46 = vsub.f32 %v1628_v4, %v1632_v6 }
 0x1fd   : > { %1310 = vmatmul.mubr.msk.f32.vlgmr.msra.gmra.mrb[2].mxu0 %vm556_vm1, %v798_v51  ;;  %1319 = vmatmul.mubr.msk.f32.vlgmr.msra.gmra.mrb[10].mxu1 %vm556_vm1, %v804_v52 }
 0x1fe   : > { %1312 = vmatprep.mubr.msk.f32.mxu0 %vm556_vm1, %v799_v53  ;;  %v549_v48 = vpop.permute.xlu1 %548 }
 0x201   : > { %1313 = vmatmul.mubr.msk.f32.gmra.mrb[4].mxu0 %vm556_vm1, %v800_v54 }
 0x202   : > { %1315 = vmatprep.mubr.msk.f32.mxu0 %vm556_vm1, %v801_v55  ;;  %v663_v55 = vadd.f32 %v1756_v36, %v534_v43 }
 0x205   : > { %1316 = vmatmul.mubr.msk.f32.gmra.mrb[6].mxu0 %vm556_vm1, %v802_v56 }
 0x2d0   : > { %v1311_v59 = vpop.f32.mrb[2].mxu0  ;;  %v1320_v60 = vpop.f32.mrb[10].mxu1 }
 0x2d1   : > { %v909_v61 = vadd.f32 %v1311_v59, %v806_v57  ;;  %v903_v62 = vpop.f32.mrb[3].mxu0  ;;  %v933_v63 = vpop.f32.mrb[11].mxu1  ;;  %v939_v31 = vadd.f32 %v1320_v60, %v812_v22  ;;  %v658_v57 = vadd.f32 %v1758_v37, %v529_v42  ;;  %v683_v37 = vadd.f32 %v1764_v40, %v554_v47 }
 0x2d2   : > { %v904_v0 = vadd.f32 %v903_v62, %v805_v58  ;;  %v934_v32 = vadd.f32 %v933_v63, %v811_v29 }
 0x2d3   : > { %949 = vperm.xlu0 %1406, %v909_v61  }
 0x2d4   : > { %v1314_v3 = vpop.f32.mrb[4].mxu0  ;;  %944 = vperm.xlu1 %1405, %v904_v0  }
 0x2d5   : > { %v919_v8 = vadd.f32 %v1314_v3, %v808_v1  ;;  %v913_v11 = vpop.f32.mrb[5].mxu0 }
 0x2d6   : > { %v914_v15 = vadd.f32 %v913_v11, %v807_v2  ;;  %v678_v11 = vadd.f32 %v1766_v41, %v549_v48 }
 0x2d7   : > { %959 = vperm.xlu0 %1406, %v919_v8  }
 0x2d8   : > { %v1317_v21 = vpop.f32.mrb[6].mxu0  ;;  %954 = vperm.xlu1 %1405, %v914_v15  }
 0x2d9   : > { %v929_v24 = vadd.f32 %v1317_v21, %v810_v16  ;;  %v923_v28 = vpop.f32.mrb[7].mxu0 }
 0x2da   : > { %v924_v30 = vadd.f32 %v923_v28, %v809_v20 }
 0x2db   : > { %969 = vperm.xlu0 %1406, %v929_v24  }
 0x2dc   : > { %964 = vperm.xlu1 %1405, %v924_v30  }
 0x2df   : > { %979 = vperm.xlu0 %1406, %v939_v31  }
 0x2e0   : > { %974 = vperm.xlu1 %1405, %v934_v32  }
 0x352   : > { %v950_v51 = vpop.permute.xlu0 %949 }
 0x353   : > { %v983_v52 = vadd.f32 %v950_v51, %v653_v49  ;;  %v945_v53 = vpop.permute.xlu1 %944  ;;  %v1041_v51 = vsub.f32 %v1640_v10, %v1646_v13 }
 0x354   : > { %v982_v54 = vadd.f32 %v945_v53, %v648_v50 }
 0x355   : > { %v1196_v56 = vmul.f32 -1.442695, %v983_v52 }
 0x356   : > { %v1195_v58 = vmul.f32 -1.442695, %v982_v54  ;;  %v960_v59 = vpop.permute.xlu0 %959 }
 0x357   : > { %1407 = vpow2.f32 %v1196_v56  ;;  %v985_v60 = vadd.f32 %v960_v59, %v663_v55  ;;  %v955_v61 = vpop.permute.xlu1 %954  ;;  %v1043_v59 = vsub.f32 %v1654_v17, %v1658_v19 }
 0x358   : > { %1409 = vpow2.f32 %v1195_v58  ;;  %v984_v62 = vadd.f32 %v955_v61, %v658_v57  ;;  %v1042_v61 = vsub.f32 %v1648_v14, %v1656_v18  ;;  %v1045_v14 = vsub.f32 %v1666_v25, %v1670_v27 }
 0x359   : > { %v1198_v63 = vmul.f32 -1.442695, %v985_v60 }
 0x35a   : > { %v1197_v0 = vmul.f32 -1.442695, %v984_v62  ;;  %v970_v1 = vpop.permute.xlu0 %969 }
 0x35b   : > { %1411 = vpow2.f32 %v1198_v63  ;;  %v987_v2 = vadd.f32 %v970_v1, %v673_v34  ;;  %v965_v36 = vpop.permute.xlu1 %964 }
 0x35c   : > { %1413 = vpow2.f32 %v1197_v0  ;;  %v986_v3 = vadd.f32 %v965_v36, %v668_v35 }
 0x35d   : > { %v1200_v8 = vmul.f32 -1.442695, %v987_v2 }
 0x35e   : > { %v1199_v15 = vmul.f32 -1.442695, %v986_v3  ;;  %v980_v16 = vpop.permute.xlu0 %979 }
 0x35f   : > { %1415 = vpow2.f32 %v1200_v8  ;;  %v989_v20 = vadd.f32 %v980_v16, %v683_v37  ;;  %v975_v38 = vpop.permute.xlu1 %974 }
 0x360   : > { %1417 = vpow2.f32 %v1199_v15  ;;  %v988_v21 = vadd.f32 %v975_v38, %v678_v11 }
 0x361   : > { %v1408_v39 = vpop.eup %1407  ;;  %v1202_v22 = vmul.f32 -1.442695, %v989_v20 }
 0x362   : > { %v1410_v24 = vpop.eup %1409  ;;  %v1015_v28 = vadd.f32 1.0, %v1408_v39  ;;  %v1201_v29 = vmul.f32 -1.442695, %v988_v21 }
 0x363   : > { %v1014_v30 = vadd.f32 1.0, %v1410_v24  ;;  %1419 = vpow2.f32 %v1202_v22 }
 0x364   : > { %1421 = vrcp.f32 %v1015_v28 }
 0x365   : > { %v1412_v40 = vpop.eup %1411  ;;  %1423 = vrcp.f32 %v1014_v30 }
 0x366   : > { %v1414_v31 = vpop.eup %1413  ;;  %v1017_v41 = vadd.f32 1.0, %v1412_v40  ;;  %1425 = vpow2.f32 %v1201_v29 }
 0x367   : > { %v1016_v32 = vadd.f32 1.0, %v1414_v31 }
 0x368   : > { %1427 = vrcp.f32 %v1017_v41 }
 0x369   : > { %v1416_v33 = vpop.eup %1415  ;;  %1429 = vrcp.f32 %v1016_v32 }
 0x36a   : > { %v1418_v42 = vpop.eup %1417  ;;  %v1019_v43 = vadd.f32 1.0, %v1416_v33 }
 0x36b   : > { %v1018_v45 = vadd.f32 1.0, %v1418_v42 }
 0x36c   : > { %1431 = vrcp.f32 %v1019_v43 }
 0x36d   : > { %v1420_v47 = vpop.eup %1419  ;;  %1433 = vrcp.f32 %v1018_v45 }
 0x36e   : > { %v1422_v48 = vpop.eup %1421  ;;  %v1021_v49 = vadd.f32 1.0, %v1420_v47 }
 0x36f   : > { %v1424_v50 = vpop.eup %1423  ;;  %v1047_v52 = vmul.f32 %v1422_v48, %v1039_v44 }
 0x370   : > { %v1426_v53 = vpop.eup %1425  ;;  %v1046_v54 = vmul.f32 %v1424_v50, %v1038_v46  ;;  %1435 = vrcp.f32 %v1021_v49 }
 0x371   : > { %v1055_v4 = vadd.f32 %v1047_v52, %v1634_v7  ;;  %v1020_v55 = vadd.f32 1.0, %v1426_v53 }
 0x372   : > { %v1428_v56 = vpop.eup %1427  ;;  %v1054_v57 = vadd.f32 %v1046_v54, %v1632_v6 }
 0x373   : > { %v1430_v58 = vpop.eup %1429  ;;  %v1063_v10 = vmul.f32 2.0, %v1055_v4  ;;  %v1049_v60 = vmul.f32 %v1428_v56, %v1041_v51  ;;  %1437 = vrcp.f32 %v1020_v55 }
 0x374   : > { %v1062_v62 = vmul.f32 2.0, %v1054_v57  ;;  %v1048_v9 = vmul.f32 %v1430_v58, %v1040_v5 }
 0x375   : > { %1071 = vst [vmem:[%s1847_s27 + $0x8] sm:$0xff] %v1063_v10  ;;  %v1057_v6 = vadd.f32 %v1049_v60, %v1646_v13 }
 0x376   : > { %v1432_v7 = vpop.eup %1431  ;;  %1070 = vst [vmem:[%s1847_s27] sm:$0xff] %v1062_v62  ;;  %v1056_v17 = vadd.f32 %v1048_v9, %v1644_v12  ;;  %v1044_v12 = vsub.f32 %v1664_v23, %v1668_v26 }
 0x377   : > { %v1434_v34 = vpop.eup %1433  ;;  %v1065_v63 = vmul.f32 2.0, %v1057_v6  ;;  %v1051_v35 = vmul.f32 %v1432_v7, %v1043_v59 }
 0x378   : > { %v1064_v0 = vmul.f32 2.0, %v1056_v17  ;;  %v1050_v1 = vmul.f32 %v1434_v34, %v1042_v61 }
 0x379   : > { %1073 = vst [vmem:[%s1847_s27 + $0x18] sm:$0xff] %v1065_v63  ;;  %v1059_v2 = vadd.f32 %v1051_v35, %v1658_v19 }
 0x37a   : > { %v1436_v13 = vpop.eup %1435  ;;  %1072 = vst [vmem:[%s1847_s27 + $0x10] sm:$0xff] %v1064_v0  ;;  %v1058_v36 = vadd.f32 %v1050_v1, %v1656_v18 }
 0x37b   : > { %v1067_v3 = vmul.f32 2.0, %v1059_v2  ;;  %v1053_v25 = vmul.f32 %v1436_v13, %v1045_v14 }
 0x37c   : > { %v1066_v37 = vmul.f32 2.0, %v1058_v36 }
 0x37d   : > { %v1438_v8 = vpop.eup %1437  ;;  %1075 = vst [vmem:[%s1847_s27 + $0x28] sm:$0xff] %v1067_v3  ;;  %v1061_v11 = vadd.f32 %v1053_v25, %v1670_v27 }
 0x37e   : > { %1074 = vst [vmem:[%s1847_s27 + $0x20] sm:$0xff] %v1066_v37  ;;  %v1052_v19 = vmul.f32 %v1438_v8, %v1044_v12 }
 0x37f   : > { %v1069_v15 = vmul.f32 2.0, %v1061_v11 }
 0x380   : > { %v1060_v23 = vadd.f32 %v1052_v19, %v1668_v26 }
 0x381   : > { %1077 = vst [vmem:[%s1847_s27 + $0x38] sm:$0xff] %v1069_v15 }
 0x382   : > { %v1068_v18 = vmul.f32 2.0, %v1060_v23 }
 0x384   : > { %1076 = vst [vmem:[%s1847_s27 + $0x30] sm:$0xff] %v1068_v18 }
 0x385   : > { %1452 = shalt.err (!%p1449_p3)
}
 0x386   : > { %s1453_s25 = scalar_lea.hbm %s1871_s12, 1024  ;;  %s1457_s30 = scalar_lea.hbm %s1929_s10, 2048 }
 0x387   : > { %p1454_p4 = scmp.ne.s32.totalorder %s1871_s12, %s1453_s25  ;;  %p1458_p9 = scmp.lt.u32.totalorder %s1871_s12, %s1929_s10 }
 0x388   : > { %p1459_p10 = scmp.lt.u32.totalorder %s1457_s30, %s1453_s25  ;;  %p1461_p12 = scmp.lt.u32.totalorder %s1453_s25, %s1871_s12 }
 0x389   : > { %p1455_p7 = pnand %p1454_p4, %p1600_p5 }
 0x38a   : > { %p1460_p11 = por %p1459_p10, %p1458_p9 }
 0x38b   : > { %p1456_p8 = pneg %p1455_p7 }
 0x38c   : > { %p1462_p13 = por %p1461_p12, %p1460_p11 }
 0x38e   : > { %p1463_p0 = pnand %p1462_p13, %p1456_p8 }
 0x390   : > { %1466 = shalt.err (!%p1463_p0)
}
 0x391   : > { %s1505_s17 = smov 128   ;;  %s1506_s21 = smov 8  }
 0x392   : > { %1363 = dma.vmem_to_hbm [thread:$0]  (%p1600_p5), %s1873_s29, 1024, %s1871_s12, %s1878_s18, %s1505_s17, %s1505_s17, %s1506_s21  }
 0x393 PF: > { %p1369_p1 = scmp.ge.s32.totalorder %s1501_s16, 2  ;;  %s1107_s26 = sand.u32 1, %s1489_s13  }
 0x394   : > { %s1108_s25 = scalar_lea.sflag [#allocation3], %s1107_s26 }
 0x395   : > { %p1366_p2 = pnand %p1369_p1, %p1604_p6 }
 0x397   : > { %1484 = dma.done.wait (!%p1366_p2), %s1108_s25, 1024  }
 0x398   : > { %1486 = vsyncadd (!%p1366_p2), %s1108_s25, 4294966272  ;;  %p20_p3 = scmp.ge.s32.totalorder %s1587_s19, 4   ;;  %s1932_s13 = smov %s1493_s14 }
 0x399   : > { %s1933_s14 = smov %s1497_s15  ;;  %s1934_s15 = smov %s1598_s22 }
 0x39a   : > { %s1935_s16 = smov %s1587_s19  ;;  %22 = sbr.rel (!%p20_p3) target bundleno = 3 (0x3), region = 98 }
 0x3a1   :  { %1113 = vsyncpa [#allocation3], 1 }
 0x3a2   :  { %1115 = vsyncpa [#allocation3 + $0x1], 1 }

</bundles_post_ra>
